<compile_context>
chip_gen: v6e
topology: v6e:2x2x1
jax: 0.10.0
libtpu: 0.0.40
codegen_flags: <defaults>
</compile_context>

<pallas_src>
import numpy as np
import jax
import jax.numpy as jnp
from jax.experimental import pallas as pl
from jax.experimental.pallas import tpu as pltpu

EPS = 1e-5

# -------- small config consistent with the ConvLin module --------
BATCH = 2
SEQ = 16                           # input sequence length
NFEATS = 4                         # cfg.data.nfeats
CONV_CHANNELS = (8, 16, 32, 32)    # params.conv.n_channels
KERNELS = (3, 3, 3, 3)             # params.conv.kernels
PADDINGS = (1, 1, 1, 1)            # params.conv.padding
MAXPOOL = (2, 2)                   # params.conv.maxpool = (kernel, stride)
LIN_SIZES = (32, 16)               # params.lin.size
LSEQ = 8                           # cfg.data.lseq
# Seq reduction: 16 -> 8 -> 4 -> 2 -> 1, so out.squeeze(2) is valid.


def _compute_geometry():
    geo = []
    L, cin = SEQ, NFEATS
    pk, ps = MAXPOOL
    for cout, K, pad in zip(CONV_CHANNELS, KERNELS, PADDINGS):
        Lpad = L + 2 * pad                     # per-batch padded length
        Lout = Lpad - K + 1                    # per-batch conv output length
        Lpool = (Lout - pk) // ps + 1          # per-batch pooled length
        Ltot_in = BATCH * Lpad                 # batch-merged padded length
        Ltot_out = Ltot_in - K + 1             # batch-merged conv output length
        # batch-merged pooling: one set of pk strided reads covers both batches
        assert Lpad % ps == 0, "batch segment starts must stay stride-aligned"
        Npool = (BATCH - 1) * Lpad // ps + Lpool
        assert (pk - 1) + (Npool - 1) * ps <= Ltot_out - 1, "pool read OOB"
        geo.append(dict(L=L, Cin=cin, Cout=cout, K=K, pad=pad, Lpad=Lpad,
                        Lout=Lout, Lpool=Lpool, Ltot_in=Ltot_in,
                        Ltot_out=Ltot_out, Npool=Npool))
        L, cin = Lpool, cout
    assert L == 1, "pipeline must reduce seq length to 1 (torch squeeze(2))"
    return tuple(geo)


GEOMETRY = _compute_geometry()
NLAYERS = len(GEOMETRY)
LIN_DIMS = (CONV_CHANNELS[-1], LIN_SIZES[0], LIN_SIZES[1], LSEQ)


# -------- packed-parameter layout (one lane-padded f32 array) ----------------
def _round8(n):
    return -(-n // 8) * 8


def _build_pack_layout():
    conv_w_row, lin_w_row, off = [], [], 0
    for g in GEOMETRY:                      # im2col conv weights (K*Cin, Cout)
        conv_w_row.append(off)
        off += _round8(g["K"] * g["Cin"])
    for i in range(3):                      # linear weights (in, out)
        lin_w_row.append(off)
        off += _round8(LIN_DIMS[i])
    shift_row = off                         # 4 conv shifts, 2 lin shifts, bias
    off += _round8(NLAYERS + 3)
    lanes = max(max(CONV_CHANNELS), max(LIN_SIZES), LSEQ, NFEATS)
    return tuple(conv_w_row), tuple(lin_w_row), shift_row, off, lanes


CONV_W_ROW, LIN_W_ROW, SHIFT_ROW, PACK_ROWS, PACK_LANES = _build_pack_layout()


# ---------------- fused kernel: 4x(Conv1d+BN+ReLU+MaxPool) + MLP head --------
def _convlin_fused_kernel(x_ref, p_ref, o_ref,
                          xp1, xp2, xp3, xp4, y1, y2, y3, y4):
    pk, ps = MAXPOOL
    xps = (xp1, xp2, xp3, xp4)
    ys = (y1, y2, y3, y4)

    # Zero the batch-merged padded-input scratches once.  Interior rows are
    # overwritten below; the halo rows stay zero and provide both the Conv1d
    # zero padding and the separation between the two batch segments.
    for xp in xps:
        xp[...] = jnp.zeros_like(xp)

    # Place both batch elements of the input into layer 1's padded buffer.
    g0 = GEOMETRY[0]
    for b in range(BATCH):
        r0 = b * g0["Lpad"] + g0["pad"]
        xps[0][r0:r0 + g0["L"], :] = x_ref[b]

    feats = None
    for li, g in enumerate(GEOMETRY):
        K, Cin, Cout = g["K"], g["Cin"], g["Cout"]
        Lpad, Lpool = g["Lpad"], g["Lpool"]
        Lt_out, Npool = g["Ltot_out"], g["Npool"]
        xp, y = xps[li], ys[li]

        # im2col over the batch-merged buffer: lane-concat the K shifted views
        # -> ONE (Lt_out, K*Cin) @ (K*Cin, Cout) MXU matmul per layer.
        xv = xp[...]
        col = jnp.concatenate([xv[k:k + Lt_out, :] for k in range(K)], axis=1)
        w = p_ref[CONV_W_ROW[li]:CONV_W_ROW[li] + K * Cin, 0:Cout]
        sh = p_ref[SHIFT_ROW + li:SHIFT_ROW + li + 1, 0:Cout]
        z = jnp.dot(col, w, preferred_element_type=jnp.float32)
        # conv bias + BatchNorm(eval) reduce to one additive shift (the BN
        # scale is folded into the packed weights), then ReLU.  The 2*pad
        # junction rows between batch segments hold garbage and are skipped by
        # the pooling slices below.
        y[...] = jnp.maximum(z + sh, 0.0)

        if li + 1 < NLAYERS:
            # MaxPool1d(pool_k, pool_s): pk strided reads over the merged
            # buffer cover both batch segments at once.
            pm = y[pl.ds(0, Npool, stride=ps), :]
            for j in range(1, pk):
                pm = jnp.maximum(pm, y[pl.ds(j, Npool, stride=ps), :])
            # Scatter the per-batch pooled segments between the zero halos of
            # the next layer's padded buffer (junction results are dropped).
            ng = GEOMETRY[li + 1]
            nxp = xps[li + 1]
            for b in range(BATCH):
                s0 = b * Lpad // ps
                d0 = b * ng["Lpad"] + ng["pad"]
                nxp[d0:d0 + Lpool, :] = pm[s0:s0 + Lpool, :]
        else:
            # Last layer: Lpool == 1, so batch-strided reads give the
            # (BATCH, Cout) feature matrix (== torch .squeeze(2)) directly.
            feats = y[pl.ds(0, BATCH, stride=Lpad), :]
            for j in range(1, pk):
                feats = jnp.maximum(feats, y[pl.ds(j, BATCH, stride=Lpad), :])

    # 3-layer MLP head on the whole batch (Dropout = eval identity; BN scale
    # folded into the packed weights, additive shift only).
    d0, d1, d2, d3 = LIN_DIMS
    h = jnp.dot(feats, p_ref[LIN_W_ROW[0]:LIN_W_ROW[0] + d0, 0:d1],
                preferred_element_type=jnp.float32)
    h = jnp.maximum(h + p_ref[SHIFT_ROW + NLAYERS:SHIFT_ROW + NLAYERS + 1, 0:d1], 0.0)
    h = jnp.dot(h, p_ref[LIN_W_ROW[1]:LIN_W_ROW[1] + d1, 0:d2],
                preferred_element_type=jnp.float32)
    h = jnp.maximum(h + p_ref[SHIFT_ROW + NLAYERS + 1:SHIFT_ROW + NLAYERS + 2, 0:d2], 0.0)
    o_ref[...] = (jnp.dot(h, p_ref[LIN_W_ROW[2]:LIN_W_ROW[2] + d2, 0:d3],
                          preferred_element_type=jnp.float32)
                  + p_ref[SHIFT_ROW + NLAYERS + 2:SHIFT_ROW + NLAYERS + 3, 0:d3])


# ---------------- host-side parameter folding + packing ----------------------
def pack_params(conv_blocks, lin):
    """Fold (conv bias + BN eval) into scaled weights + additive shifts and
    pack every constant operand into ONE lane-padded f32 array (single DMA)."""
    # TODO(synk): Dropout layers are eval-mode identity; training-mode BN batch
    # statistics are not reproduced (running stats are used instead).
    P = jnp.zeros((PACK_ROWS, PACK_LANES), jnp.float32)
    for li, (p, g) in enumerate(zip(conv_blocks, GEOMETRY)):
        scale = p["gamma"] / jnp.sqrt(p["var"] + EPS)
        shift = (p["b"] - p["mean"]) * scale + p["beta"]
        # (K, Cin, Cout) * scale[Cout]  ->  im2col layout (K*Cin, Cout),
        # tap-major rows to match the kernel's lane-concat order.
        wf = (p["w"] * scale[None, None, :]).reshape(g["K"] * g["Cin"], g["Cout"])
        r = CONV_W_ROW[li]
        P = P.at[r:r + wf.shape[0], :wf.shape[1]].set(wf)
        P = P.at[SHIFT_ROW + li, :shift.shape[0]].set(shift)
    for i, p in enumerate(lin):
        w = p["w"]
        if i < 2:
            scale = p["gamma"] / jnp.sqrt(p["var"] + EPS)
            w = w * scale[None, :]
            shift = (p["b"] - p["mean"]) * scale + p["beta"]
        else:
            shift = p["b"]
        r = LIN_W_ROW[i]
        P = P.at[r:r + w.shape[0], :w.shape[1]].set(w)
        P = P.at[SHIFT_ROW + NLAYERS + i, :shift.shape[0]].set(shift)
    return P


# ---------------- full forward (single Pallas call) ---------------------------
def conv_lin_forward(x, packed_params):
    # x: (B, SEQ, NFEATS) -- same tensor PyTorch receives (before transpose(1,2))
    scratch = []
    for g in GEOMETRY:   # batch-merged padded inputs (zero halos = conv padding)
        scratch.append(pltpu.VMEM((g["Ltot_in"], g["Cin"]), jnp.float32))
    for g in GEOMETRY:   # batch-merged pre-pool conv outputs
        scratch.append(pltpu.VMEM((g["Ltot_out"], g["Cout"]), jnp.float32))

    # Single grid point: all weights + intermediates live in VMEM (~42 KB),
    # exactly 2 input DMAs and 1 output DMA.
    # TODO(synk): on v7x a grid over batch tiles with dimension_semantics=
    # ("parallel",) would engage the second TensorCore, but at BATCH=2 the
    # per-step grid overhead outweighs the gain.
    return pl.pallas_call(
        _convlin_fused_kernel,
        out_shape=jax.ShapeDtypeStruct((BATCH, LSEQ), jnp.float32),
        in_specs=[pl.BlockSpec(memory_space=pltpu.MemorySpace.VMEM)] * 2,
        out_specs=pl.BlockSpec(memory_space=pltpu.MemorySpace.VMEM),
        scratch_shapes=scratch,
    )(x, packed_params)


# ---------------- parameter init (deterministic, synthetic) -----------------
def init_params(key):
    ks = iter(jax.random.split(key, 64))

    def nrm(shape, scale):
        return scale * jax.random.normal(next(ks), shape, jnp.float32)

    conv_blocks = []
    cin = NFEATS
    for cout, ksz in zip(CONV_CHANNELS, KERNELS):
        conv_blocks.append(dict(
            w=nrm((ksz, cin, cout), 0.3),       # (K, Cin, Cout) == torch W.T(2,1,0)
            b=nrm((cout,), 0.1),
            gamma=1.0 + nrm((cout,), 0.1),
            beta=nrm((cout,), 0.1),
            mean=nrm((cout,), 0.1),
            var=1.0 + jnp.abs(nrm((cout,), 0.1)),
        ))
        cin = cout

    lin = []
    for i in range(3):
        p = dict(w=nrm((LIN_DIMS[i], LIN_DIMS[i + 1]), 0.3),   # (in, out) == torch W.T
                 b=nrm((LIN_DIMS[i + 1],), 0.1))
        if i < 2:
            p.update(gamma=1.0 + nrm((LIN_DIMS[i + 1],), 0.1),
                     beta=nrm((LIN_DIMS[i + 1],), 0.1),
                     mean=nrm((LIN_DIMS[i + 1],), 0.1),
                     var=1.0 + jnp.abs(nrm((LIN_DIMS[i + 1],), 0.1)))
        lin.append(p)
    return conv_blocks, lin


# ---------------- pure-JAX reference ------------------------------------------
def ref_forward(x, conv_blocks, lin):
    h = x
    for p, pad, ksz in zip(conv_blocks, PADDINGS, KERNELS):
        xp = jnp.pad(h, ((0, 0), (pad, pad), (0, 0)))
        Lout = xp.shape[1] - ksz + 1
        z = sum(jnp.einsum('blc,cd->bld', xp[:, k:k + Lout, :], p["w"][k])
                for k in range(ksz)) + p["b"]
        z = (z - p["mean"]) * (p["gamma"] / jnp.sqrt(p["var"] + EPS)) + p["beta"]
        z = jnp.maximum(z, 0.0)
        pk, ps = MAXPOOL
        Lp = (Lout - pk) // ps + 1
        h = jnp.stack([z[:, j:j + (Lp - 1) * ps + 1:ps, :]
                       for j in range(pk)], 0).max(0)
    h = h[:, 0, :]
    for i, p in enumerate(lin):
        h = h @ p["w"] + p["b"]
        if i < 2:
            h = (h - p["mean"]) * (p["gamma"] / jnp.sqrt(p["var"] + EPS)) + p["beta"]
            h = jnp.maximum(h, 0.0)
    return h


if __name__ == "__main__":
    key = jax.random.PRNGKey(0)
    kx, kp = jax.random.split(key)
    x = jax.random.normal(kx, (BATCH, SEQ, NFEATS), jnp.float32)
    conv_blocks, lin = init_params(kp)
    packed = pack_params(conv_blocks, lin)

    out = conv_lin_forward(x, packed)
    out = jax.block_until_ready(out)

    ref = ref_forward(x, conv_blocks, lin)
    np.testing.assert_allclose(np.asarray(out), np.asarray(ref),
                               rtol=1e-4, atol=1e-4)
    assert out.shape == (BATCH, LSEQ)
    print("KERNEL_OK")
</pallas_src>

<mosaic_0001>
module attributes {stable_mosaic.version = 11 : i64} {
  func.func @_convlin_fused_kernel(%arg0: memref<2x16x4xf32, #tpu.memory_space<vmem>>, %arg1: memref<272x32xf32, #tpu.memory_space<vmem>>, %arg2: memref<2x8xf32, #tpu.memory_space<vmem>>, %arg3: memref<36x4xf32, #tpu.memory_space<vmem>>, %arg4: memref<20x8xf32, #tpu.memory_space<vmem>>, %arg5: memref<12x16xf32, #tpu.memory_space<vmem>>, %arg6: memref<8x32xf32, #tpu.memory_space<vmem>>, %arg7: memref<34x8xf32, #tpu.memory_space<vmem>>, %arg8: memref<18x16xf32, #tpu.memory_space<vmem>>, %arg9: memref<10x32xf32, #tpu.memory_space<vmem>>, %arg10: memref<6x32xf32, #tpu.memory_space<vmem>>) attributes {dimension_semantics = [], scalar_prefetch = 0 : i64, scratch_operands = 8 : i64, tpu.core_type = #tpu.core_type<tc>} {
    %cst = arith.constant 0.000000e+00 : f32
    %0 = vector.broadcast %cst : f32 to vector<36x4xf32>
    %c0 = arith.constant 0 : index
    %c0_0 = arith.constant 0 : index
    %1 = vector.load %arg3[%c0, %c0_0] : memref<36x4xf32, #tpu.memory_space<vmem>>, vector<36x4xf32>
    tpu.vector_store %arg3[%c0, %c0_0], %0 {strides = array<i32>} : memref<36x4xf32, #tpu.memory_space<vmem>>, vector<36x4xf32>,
    %cst_1 = arith.constant 0.000000e+00 : f32
    %2 = vector.broadcast %cst_1 : f32 to vector<20x8xf32>
    %c0_2 = arith.constant 0 : index
    %c0_3 = arith.constant 0 : index
    %3 = vector.load %arg4[%c0_2, %c0_3] : memref<20x8xf32, #tpu.memory_space<vmem>>, vector<20x8xf32>
    tpu.vector_store %arg4[%c0_2, %c0_3], %2 {strides = array<i32>} : memref<20x8xf32, #tpu.memory_space<vmem>>, vector<20x8xf32>,
    %cst_4 = arith.constant 0.000000e+00 : f32
    %4 = vector.broadcast %cst_4 : f32 to vector<12x16xf32>
    %c0_5 = arith.constant 0 : index
    %c0_6 = arith.constant 0 : index
    %5 = vector.load %arg5[%c0_5, %c0_6] : memref<12x16xf32, #tpu.memory_space<vmem>>, vector<12x16xf32>
    tpu.vector_store %arg5[%c0_5, %c0_6], %4 {strides = array<i32>} : memref<12x16xf32, #tpu.memory_space<vmem>>, vector<12x16xf32>,
    %cst_7 = arith.constant 0.000000e+00 : f32
    %6 = vector.broadcast %cst_7 : f32 to vector<8x32xf32>
    %c0_8 = arith.constant 0 : index
    %c0_9 = arith.constant 0 : index
    %7 = vector.load %arg6[%c0_8, %c0_9] : memref<8x32xf32, #tpu.memory_space<vmem>>, vector<8x32xf32>
    tpu.vector_store %arg6[%c0_8, %c0_9], %6 {strides = array<i32>} : memref<8x32xf32, #tpu.memory_space<vmem>>, vector<8x32xf32>,
    %c0_10 = arith.constant 0 : index
    %c0_11 = arith.constant 0 : index
    %c0_12 = arith.constant 0 : index
    %8 = vector.load %arg0[%c0_10, %c0_11, %c0_12] : memref<2x16x4xf32, #tpu.memory_space<vmem>>, vector<1x16x4xf32>
    %9 = vector.shape_cast %8 : vector<1x16x4xf32> to vector<16x4xf32>
    %c1 = arith.constant 1 : index
    %c0_13 = arith.constant 0 : index
    %10 = vector.load %arg3[%c1, %c0_13] : memref<36x4xf32, #tpu.memory_space<vmem>>, vector<16x4xf32>
    tpu.vector_store %arg3[%c1, %c0_13], %9 {strides = array<i32>} : memref<36x4xf32, #tpu.memory_space<vmem>>, vector<16x4xf32>,
    %c1_14 = arith.constant 1 : index
    %c0_15 = arith.constant 0 : index
    %c0_16 = arith.constant 0 : index
    %11 = vector.load %arg0[%c1_14, %c0_15, %c0_16] : memref<2x16x4xf32, #tpu.memory_space<vmem>>, vector<1x16x4xf32>
    %12 = vector.shape_cast %11 : vector<1x16x4xf32> to vector<16x4xf32>
    %c19 = arith.constant 19 : index
    %c0_17 = arith.constant 0 : index
    %13 = vector.load %arg3[%c19, %c0_17] : memref<36x4xf32, #tpu.memory_space<vmem>>, vector<16x4xf32>
    tpu.vector_store %arg3[%c19, %c0_17], %12 {strides = array<i32>} : memref<36x4xf32, #tpu.memory_space<vmem>>, vector<16x4xf32>,
    %c0_18 = arith.constant 0 : index
    %c0_19 = arith.constant 0 : index
    %14 = vector.load %arg3[%c0_18, %c0_19] : memref<36x4xf32, #tpu.memory_space<vmem>>, vector<36x4xf32>
    %15 = vector.extract_strided_slice %14 {offsets = [0, 0], sizes = [34, 4], strides = [1, 1]} : vector<36x4xf32> to vector<34x4xf32>
    %16 = vector.extract_strided_slice %14 {offsets = [1, 0], sizes = [34, 4], strides = [1, 1]} : vector<36x4xf32> to vector<34x4xf32>
    %17 = vector.extract_strided_slice %14 {offsets = [2, 0], sizes = [34, 4], strides = [1, 1]} : vector<36x4xf32> to vector<34x4xf32>
    %18 = tpu.concatenate %15, %16, %17 in 1 : vector<34x4xf32>, vector<34x4xf32>, vector<34x4xf32> -> vector<34x12xf32>
    %c0_20 = arith.constant 0 : index
    %c0_21 = arith.constant 0 : index
    %19 = vector.load %arg1[%c0_20, %c0_21] : memref<272x32xf32, #tpu.memory_space<vmem>>, vector<12x8xf32>
    %c264 = arith.constant 264 : index
    %c0_22 = arith.constant 0 : index
    %20 = vector.load %arg1[%c264, %c0_22] : memref<272x32xf32, #tpu.memory_space<vmem>>, vector<1x8xf32>
    %cst_23 = arith.constant dense<0.000000e+00> : vector<34x8xf32>
    %21 = tpu.matmul %18, %19, %cst_23 {dimension_numbers = #tpu.dot_dimension_numbers<[1], [0], [0], [1], [0, 0, 1, 1], [], []>} : vector<34x12xf32>, vector<12x8xf32>, vector<34x8xf32> -> vector<34x8xf32>
    %22 = vector.broadcast %20 : vector<1x8xf32> to vector<34x8xf32>
    %23 = arith.addf %21, %22 : vector<34x8xf32>
    %cst_24 = arith.constant 0.000000e+00 : f32
    %24 = vector.broadcast %cst_24 : f32 to vector<34x8xf32>
    %25 = arith.maximumf %23, %24 : vector<34x8xf32>
    %c0_25 = arith.constant 0 : index
    %c0_26 = arith.constant 0 : index
    %26 = vector.load %arg7[%c0_25, %c0_26] : memref<34x8xf32, #tpu.memory_space<vmem>>, vector<34x8xf32>
    tpu.vector_store %arg7[%c0_25, %c0_26], %25 {strides = array<i32>} : memref<34x8xf32, #tpu.memory_space<vmem>>, vector<34x8xf32>,
    %c0_27 = arith.constant 0 : index
    %c0_28 = arith.constant 0 : index
    %27 = tpu.strided_load %arg7[%c0_27, %c0_28] {strides = array<i32: 2, 1>} : memref<34x8xf32, #tpu.memory_space<vmem>>, vector<17x8xf32>
    %c1_29 = arith.constant 1 : index
    %c0_30 = arith.constant 0 : index
    %28 = tpu.strided_load %arg7[%c1_29, %c0_30] {strides = array<i32: 2, 1>} : memref<34x8xf32, #tpu.memory_space<vmem>>, vector<17x8xf32>
    %29 = arith.maximumf %27, %28 : vector<17x8xf32>
    %30 = vector.extract_strided_slice %29 {offsets = [0, 0], sizes = [8, 8], strides = [1, 1]} : vector<17x8xf32> to vector<8x8xf32>
    %c1_31 = arith.constant 1 : index
    %c0_32 = arith.constant 0 : index
    %31 = vector.load %arg4[%c1_31, %c0_32] : memref<20x8xf32, #tpu.memory_space<vmem>>, vector<8x8xf32>
    tpu.vector_store %arg4[%c1_31, %c0_32], %30 {strides = array<i32>} : memref<20x8xf32, #tpu.memory_space<vmem>>, vector<8x8xf32>,
    %32 = vector.extract_strided_slice %29 {offsets = [9, 0], sizes = [8, 8], strides = [1, 1]} : vector<17x8xf32> to vector<8x8xf32>
    %c11 = arith.constant 11 : index
    %c0_33 = arith.constant 0 : index
    %33 = vector.load %arg4[%c11, %c0_33] : memref<20x8xf32, #tpu.memory_space<vmem>>, vector<8x8xf32>
    tpu.vector_store %arg4[%c11, %c0_33], %32 {strides = array<i32>} : memref<20x8xf32, #tpu.memory_space<vmem>>, vector<8x8xf32>,
    %c0_34 = arith.constant 0 : index
    %c0_35 = arith.constant 0 : index
    %34 = vector.load %arg4[%c0_34, %c0_35] : memref<20x8xf32, #tpu.memory_space<vmem>>, vector<20x8xf32>
    %35 = vector.extract_strided_slice %34 {offsets = [0, 0], sizes = [18, 8], strides = [1, 1]} : vector<20x8xf32> to vector<18x8xf32>
    %36 = vector.extract_strided_slice %34 {offsets = [1, 0], sizes = [18, 8], strides = [1, 1]} : vector<20x8xf32> to vector<18x8xf32>
    %37 = vector.extract_strided_slice %34 {offsets = [2, 0], sizes = [18, 8], strides = [1, 1]} : vector<20x8xf32> to vector<18x8xf32>
    %38 = tpu.concatenate %35, %36, %37 in 1 : vector<18x8xf32>, vector<18x8xf32>, vector<18x8xf32> -> vector<18x24xf32>
    %c16 = arith.constant 16 : index
    %c0_36 = arith.constant 0 : index
    %39 = vector.load %arg1[%c16, %c0_36] : memref<272x32xf32, #tpu.memory_space<vmem>>, vector<24x16xf32>
    %c265 = arith.constant 265 : index
    %c0_37 = arith.constant 0 : index
    %40 = vector.load %arg1[%c265, %c0_37] : memref<272x32xf32, #tpu.memory_space<vmem>>, vector<1x16xf32>
    %cst_38 = arith.constant dense<0.000000e+00> : vector<18x16xf32>
    %41 = tpu.matmul %38, %39, %cst_38 {dimension_numbers = #tpu.dot_dimension_numbers<[1], [0], [0], [1], [0, 0, 1, 1], [], []>} : vector<18x24xf32>, vector<24x16xf32>, vector<18x16xf32> -> vector<18x16xf32>
    %42 = vector.broadcast %40 : vector<1x16xf32> to vector<18x16xf32>
    %43 = arith.addf %41, %42 : vector<18x16xf32>
    %cst_39 = arith.constant 0.000000e+00 : f32
    %44 = vector.broadcast %cst_39 : f32 to vector<18x16xf32>
    %45 = arith.maximumf %43, %44 : vector<18x16xf32>
    %c0_40 = arith.constant 0 : index
    %c0_41 = arith.constant 0 : index
    %46 = vector.load %arg8[%c0_40, %c0_41] : memref<18x16xf32, #tpu.memory_space<vmem>>, vector<18x16xf32>
    tpu.vector_store %arg8[%c0_40, %c0_41], %45 {strides = array<i32>} : memref<18x16xf32, #tpu.memory_space<vmem>>, vector<18x16xf32>,
    %c0_42 = arith.constant 0 : index
    %c0_43 = arith.constant 0 : index
    %47 = tpu.strided_load %arg8[%c0_42, %c0_43] {strides = array<i32: 2, 1>} : memref<18x16xf32, #tpu.memory_space<vmem>>, vector<9x16xf32>
    %c1_44 = arith.constant 1 : index
    %c0_45 = arith.constant 0 : index
    %48 = tpu.strided_load %arg8[%c1_44, %c0_45] {strides = array<i32: 2, 1>} : memref<18x16xf32, #tpu.memory_space<vmem>>, vector<9x16xf32>
    %49 = arith.maximumf %47, %48 : vector<9x16xf32>
    %50 = vector.extract_strided_slice %49 {offsets = [0, 0], sizes = [4, 16], strides = [1, 1]} : vector<9x16xf32> to vector<4x16xf32>
    %c1_46 = arith.constant 1 : index
    %c0_47 = arith.constant 0 : index
    %51 = vector.load %arg5[%c1_46, %c0_47] : memref<12x16xf32, #tpu.memory_space<vmem>>, vector<4x16xf32>
    tpu.vector_store %arg5[%c1_46, %c0_47], %50 {strides = array<i32>} : memref<12x16xf32, #tpu.memory_space<vmem>>, vector<4x16xf32>,
    %52 = vector.extract_strided_slice %49 {offsets = [5, 0], sizes = [4, 16], strides = [1, 1]} : vector<9x16xf32> to vector<4x16xf32>
    %c7 = arith.constant 7 : index
    %c0_48 = arith.constant 0 : index
    %53 = vector.load %arg5[%c7, %c0_48] : memref<12x16xf32, #tpu.memory_space<vmem>>, vector<4x16xf32>
    tpu.vector_store %arg5[%c7, %c0_48], %52 {strides = array<i32>} : memref<12x16xf32, #tpu.memory_space<vmem>>, vector<4x16xf32>,
    %c0_49 = arith.constant 0 : index
    %c0_50 = arith.constant 0 : index
    %54 = vector.load %arg5[%c0_49, %c0_50] : memref<12x16xf32, #tpu.memory_space<vmem>>, vector<12x16xf32>
    %55 = vector.extract_strided_slice %54 {offsets = [0, 0], sizes = [10, 16], strides = [1, 1]} : vector<12x16xf32> to vector<10x16xf32>
    %56 = vector.extract_strided_slice %54 {offsets = [1, 0], sizes = [10, 16], strides = [1, 1]} : vector<12x16xf32> to vector<10x16xf32>
    %57 = vector.extract_strided_slice %54 {offsets = [2, 0], sizes = [10, 16], strides = [1, 1]} : vector<12x16xf32> to vector<10x16xf32>
    %58 = tpu.concatenate %55, %56, %57 in 1 : vector<10x16xf32>, vector<10x16xf32>, vector<10x16xf32> -> vector<10x48xf32>
    %c40 = arith.constant 40 : index
    %c0_51 = arith.constant 0 : index
    %59 = vector.load %arg1[%c40, %c0_51] : memref<272x32xf32, #tpu.memory_space<vmem>>, vector<48x32xf32>
    %c266 = arith.constant 266 : index
    %c0_52 = arith.constant 0 : index
    %60 = vector.load %arg1[%c266, %c0_52] : memref<272x32xf32, #tpu.memory_space<vmem>>, vector<1x32xf32>
    %cst_53 = arith.constant dense<0.000000e+00> : vector<10x32xf32>
    %61 = tpu.matmul %58, %59, %cst_53 {dimension_numbers = #tpu.dot_dimension_numbers<[1], [0], [0], [1], [0, 0, 1, 1], [], []>} : vector<10x48xf32>, vector<48x32xf32>, vector<10x32xf32> -> vector<10x32xf32>
    %62 = vector.broadcast %60 : vector<1x32xf32> to vector<10x32xf32>
    %63 = arith.addf %61, %62 : vector<10x32xf32>
    %cst_54 = arith.constant 0.000000e+00 : f32
    %64 = vector.broadcast %cst_54 : f32 to vector<10x32xf32>
    %65 = arith.maximumf %63, %64 : vector<10x32xf32>
    %c0_55 = arith.constant 0 : index
    %c0_56 = arith.constant 0 : index
    %66 = vector.load %arg9[%c0_55, %c0_56] : memref<10x32xf32, #tpu.memory_space<vmem>>, vector<10x32xf32>
    tpu.vector_store %arg9[%c0_55, %c0_56], %65 {strides = array<i32>} : memref<10x32xf32, #tpu.memory_space<vmem>>, vector<10x32xf32>,
    %c0_57 = arith.constant 0 : index
    %c0_58 = arith.constant 0 : index
    %67 = tpu.strided_load %arg9[%c0_57, %c0_58] {strides = array<i32: 2, 1>} : memref<10x32xf32, #tpu.memory_space<vmem>>, vector<5x32xf32>
    %c1_59 = arith.constant 1 : index
    %c0_60 = arith.constant 0 : index
    %68 = tpu.strided_load %arg9[%c1_59, %c0_60] {strides = array<i32: 2, 1>} : memref<10x32xf32, #tpu.memory_space<vmem>>, vector<5x32xf32>
    %69 = arith.maximumf %67, %68 : vector<5x32xf32>
    %70 = vector.extract_strided_slice %69 {offsets = [0, 0], sizes = [2, 32], strides = [1, 1]} : vector<5x32xf32> to vector<2x32xf32>
    %c1_61 = arith.constant 1 : index
    %c0_62 = arith.constant 0 : index
    %71 = vector.load %arg6[%c1_61, %c0_62] : memref<8x32xf32, #tpu.memory_space<vmem>>, vector<2x32xf32>
    tpu.vector_store %arg6[%c1_61, %c0_62], %70 {strides = array<i32>} : memref<8x32xf32, #tpu.memory_space<vmem>>, vector<2x32xf32>,
    %72 = vector.extract_strided_slice %69 {offsets = [3, 0], sizes = [2, 32], strides = [1, 1]} : vector<5x32xf32> to vector<2x32xf32>
    %c5 = arith.constant 5 : index
    %c0_63 = arith.constant 0 : index
    %73 = vector.load %arg6[%c5, %c0_63] : memref<8x32xf32, #tpu.memory_space<vmem>>, vector<2x32xf32>
    tpu.vector_store %arg6[%c5, %c0_63], %72 {strides = array<i32>} : memref<8x32xf32, #tpu.memory_space<vmem>>, vector<2x32xf32>,
    %c0_64 = arith.constant 0 : index
    %c0_65 = arith.constant 0 : index
    %74 = vector.load %arg6[%c0_64, %c0_65] : memref<8x32xf32, #tpu.memory_space<vmem>>, vector<8x32xf32>
    %75 = vector.extract_strided_slice %74 {offsets = [0, 0], sizes = [6, 32], strides = [1, 1]} : vector<8x32xf32> to vector<6x32xf32>
    %76 = vector.extract_strided_slice %74 {offsets = [1, 0], sizes = [6, 32], strides = [1, 1]} : vector<8x32xf32> to vector<6x32xf32>
    %77 = vector.extract_strided_slice %74 {offsets = [2, 0], sizes = [6, 32], strides = [1, 1]} : vector<8x32xf32> to vector<6x32xf32>
    %78 = tpu.concatenate %75, %76, %77 in 1 : vector<6x32xf32>, vector<6x32xf32>, vector<6x32xf32> -> vector<6x96xf32>
    %c88 = arith.constant 88 : index
    %c0_66 = arith.constant 0 : index
    %79 = vector.load %arg1[%c88, %c0_66] : memref<272x32xf32, #tpu.memory_space<vmem>>, vector<96x32xf32>
    %c267 = arith.constant 267 : index
    %c0_67 = arith.constant 0 : index
    %80 = vector.load %arg1[%c267, %c0_67] : memref<272x32xf32, #tpu.memory_space<vmem>>, vector<1x32xf32>
    %cst_68 = arith.constant dense<0.000000e+00> : vector<6x32xf32>
    %81 = tpu.matmul %78, %79, %cst_68 {dimension_numbers = #tpu.dot_dimension_numbers<[1], [0], [0], [1], [0, 0, 1, 1], [], []>} : vector<6x96xf32>, vector<96x32xf32>, vector<6x32xf32> -> vector<6x32xf32>
    %82 = vector.broadcast %80 : vector<1x32xf32> to vector<6x32xf32>
    %83 = arith.addf %81, %82 : vector<6x32xf32>
    %cst_69 = arith.constant 0.000000e+00 : f32
    %84 = vector.broadcast %cst_69 : f32 to vector<6x32xf32>
    %85 = arith.maximumf %83, %84 : vector<6x32xf32>
    %c0_70 = arith.constant 0 : index
    %c0_71 = arith.constant 0 : index
    %86 = vector.load %arg10[%c0_70, %c0_71] : memref<6x32xf32, #tpu.memory_space<vmem>>, vector<6x32xf32>
    tpu.vector_store %arg10[%c0_70, %c0_71], %85 {strides = array<i32>} : memref<6x32xf32, #tpu.memory_space<vmem>>, vector<6x32xf32>,
    %c0_72 = arith.constant 0 : index
    %c0_73 = arith.constant 0 : index
    %87 = tpu.strided_load %arg10[%c0_72, %c0_73] {strides = array<i32: 4, 1>} : memref<6x32xf32, #tpu.memory_space<vmem>>, vector<2x32xf32>
    %c1_74 = arith.constant 1 : index
    %c0_75 = arith.constant 0 : index
    %88 = tpu.strided_load %arg10[%c1_74, %c0_75] {strides = array<i32: 4, 1>} : memref<6x32xf32, #tpu.memory_space<vmem>>, vector<2x32xf32>
    %89 = arith.maximumf %87, %88 : vector<2x32xf32>
    %c184 = arith.constant 184 : index
    %c0_76 = arith.constant 0 : index
    %90 = vector.load %arg1[%c184, %c0_76] : memref<272x32xf32, #tpu.memory_space<vmem>>, vector<32x32xf32>
    %cst_77 = arith.constant dense<0.000000e+00> : vector<2x32xf32>
    %91 = tpu.matmul %89, %90, %cst_77 {dimension_numbers = #tpu.dot_dimension_numbers<[1], [0], [0], [1], [0, 0, 1, 1], [], []>} : vector<2x32xf32>, vector<32x32xf32>, vector<2x32xf32> -> vector<2x32xf32>
    %c268 = arith.constant 268 : index
    %c0_78 = arith.constant 0 : index
    %92 = vector.load %arg1[%c268, %c0_78] : memref<272x32xf32, #tpu.memory_space<vmem>>, vector<1x32xf32>
    %93 = vector.broadcast %92 : vector<1x32xf32> to vector<2x32xf32>
    %94 = arith.addf %91, %93 : vector<2x32xf32>
    %cst_79 = arith.constant 0.000000e+00 : f32
    %95 = vector.broadcast %cst_79 : f32 to vector<2x32xf32>
    %96 = arith.maximumf %94, %95 : vector<2x32xf32>
    %c216 = arith.constant 216 : index
    %c0_80 = arith.constant 0 : index
    %97 = vector.load %arg1[%c216, %c0_80] : memref<272x32xf32, #tpu.memory_space<vmem>>, vector<32x16xf32>
    %cst_81 = arith.constant dense<0.000000e+00> : vector<2x16xf32>
    %98 = tpu.matmul %96, %97, %cst_81 {dimension_numbers = #tpu.dot_dimension_numbers<[1], [0], [0], [1], [0, 0, 1, 1], [], []>} : vector<2x32xf32>, vector<32x16xf32>, vector<2x16xf32> -> vector<2x16xf32>
    %c269 = arith.constant 269 : index
    %c0_82 = arith.constant 0 : index
    %99 = vector.load %arg1[%c269, %c0_82] : memref<272x32xf32, #tpu.memory_space<vmem>>, vector<1x16xf32>
    %100 = vector.broadcast %99 : vector<1x16xf32> to vector<2x16xf32>
    %101 = arith.addf %98, %100 : vector<2x16xf32>
    %cst_83 = arith.constant 0.000000e+00 : f32
    %102 = vector.broadcast %cst_83 : f32 to vector<2x16xf32>
    %103 = arith.maximumf %101, %102 : vector<2x16xf32>
    %c248 = arith.constant 248 : index
    %c0_84 = arith.constant 0 : index
    %104 = vector.load %arg1[%c248, %c0_84] : memref<272x32xf32, #tpu.memory_space<vmem>>, vector<16x8xf32>
    %cst_85 = arith.constant dense<0.000000e+00> : vector<2x8xf32>
    %105 = tpu.matmul %103, %104, %cst_85 {dimension_numbers = #tpu.dot_dimension_numbers<[1], [0], [0], [1], [0, 0, 1, 1], [], []>} : vector<2x16xf32>, vector<16x8xf32>, vector<2x8xf32> -> vector<2x8xf32>
    %c270 = arith.constant 270 : index
    %c0_86 = arith.constant 0 : index
    %106 = vector.load %arg1[%c270, %c0_86] : memref<272x32xf32, #tpu.memory_space<vmem>>, vector<1x8xf32>
    %107 = vector.broadcast %106 : vector<1x8xf32> to vector<2x8xf32>
    %108 = arith.addf %105, %107 : vector<2x8xf32>
    %c0_87 = arith.constant 0 : index
    %c0_88 = arith.constant 0 : index
    %109 = vector.load %arg2[%c0_87, %c0_88] : memref<2x8xf32, #tpu.memory_space<vmem>>, vector<2x8xf32>
    tpu.vector_store %arg2[%c0_87, %c0_88], %108 {strides = array<i32>} : memref<2x8xf32, #tpu.memory_space<vmem>>, vector<2x8xf32>,
    return
  }
}

</mosaic_0001>

<bundles_post_ra>
// kernel: tpu_custom_call.1
= control target key start
LH: loop header
LB: loop body
LE: loop exit
PB: predicated region body
PF: predicated region fallthrough
CT: control target
= control target key end

     0   :  { %vm12_vm0 = vcmask 31744   ;;  %v1124_v2 = vmov 0.0   ;;  %vm17_vm1 = vcmask 27648   ;;  %vm132_vm2 = vcmask 1043456   ;;  %s1427_s0 = inlined_call_operand.vmem [shape: f32[2,16,4], index: 0, kind: input, shape index: {}]   ;;  %s1428_s1 = inlined_call_operand.vmem [shape: f32[272,32], index: 1, kind: input, shape index: {}]   ;;  %s1429_s2 = inlined_call_operand.hbm [shape: f32[2,8], index: 2, kind: output, shape index: {}]  }
   0x1   :  { %v30_v0 = vld [vmem:[%s1427_s0] sm:$0xff]  ;;  %v31_v1 = vld [vmem:[%s1427_s0 + $0x8] sm:$0xff]  ;;  %13 = vst.msk [vmem:[#allocation2] sm:$0xff] %vm12_vm0, %v1124_v2  ;;  %14 = vst.msk [vmem:[#allocation2 + $0x8] sm:$0xff] %vm12_vm0, %v1124_v2  ;;  %989 = vmatprep.subr.mxu0 %v1124_v2  ;;  %1008 = vmatprep.subr.mxu1 %v1124_v2  ;;  %vm19_vm3 = vcmask 64512  }
   0x2   :  { %15 = vst.msk [vmem:[#allocation2 + $0x10] sm:$0xff] %vm12_vm0, %v1124_v2  ;;  %16 = vst.msk [vmem:[#allocation2 + $0x18] sm:$0xff] %vm12_vm0, %v1124_v2  ;;  %v918_v3 = vld [vmem:[%s1427_s0 + $0x10] sm:$0xff]  ;;  %v919_v4 = vld [vmem:[%s1427_s0 + $0x18] sm:$0xff] }
   0x3   :  { %32 = vst.msk [vmem:[#allocation2 + $0x1] sm:$0xff] %vm12_vm0, %v30_v0  ;;  %33 = vst.msk [vmem:[#allocation2 + $0x9] sm:$0xff] %vm12_vm0, %v31_v1  ;;  %v110_v5 = vld [vmem:[%s1428_s1 + $0x8] sm:$0xf] }
   0x4   :  { %37 = vst.msk [vmem:[#allocation2 + $0x13] sm:$0xff] %vm12_vm0, %v918_v3 }
   0x5   :  { %18 = vst.msk [vmem:[#allocation2 + $0x20] sm:$0xf] %vm17_vm1, %v1124_v2 }
   0x6   :  { %7 = vsyncpa [#allocation11], 0  ;;  %38 = vst.msk [vmem:[#allocation2 + $0x1b] sm:$0xff] %vm12_vm0, %v919_v4  ;;  %990 = vmatpush3.msk.msra.mxu0 %vm132_vm2, %v110_v5  ;;  %v109_v6 = vld [vmem:[%s1428_s1] sm:$0xff]  ;;  %vm1125_vm4 = vmmov 0   ;;  %vm49_vm5 = vcmask 1046528  }
   0x7   :  { %20 = vst.msk [vmem:[#allocation3] sm:$0xff] %vm19_vm3, %v1124_v2  ;;  %21 = vst.msk [vmem:[#allocation3 + $0x8] sm:$0xff] %vm19_vm3, %v1124_v2  ;;  %991 = vmatprep.subr.mxu0 %v1124_v2  ;;  %993 = vmatprep.mubr.msk.f32.mxu0 %vm1125_vm4, %v1124_v2  ;;  %vm74_vm6 = vcmask 1045504   ;;  %s1126_s20 = smov 4   ;;  %s1127_s21 = smov 8   ;;  %vm116_vm7 = vcmask 97280  }
   0x8   :  { %992 = vmatpush3.msra.mxu0 %v109_v6  ;;  %1014 = vmatprep.mubr.msk.f32.mxu1 %vm1125_vm4, %v1124_v2  ;;  %vm22_vm8 = vcmask 60416   ;;  %v298_v50 = vld [vmem:[%s1428_s1 + $0x20] sm:$0xff]  ;;  %v297_v51 = vld [vmem:[%s1428_s1 + $0x18] sm:$0xff]  ;;  %v920_v52 = vld [vmem:[%s1428_s1 + $0x108] ss:$0 sm:$0xff]  ;;  %vm235_vm9 = vcmask 58368  }
   0x9   :  { %1038 = vmatprep.subr.mxu0 %v1124_v2  ;;  %23 = vst.msk [vmem:[#allocation3 + $0x10] sm:$0xf] %vm22_vm8, %v1124_v2  ;;  %1009 = vmatpush3.msra.mxu1 %v298_v50  ;;  %vm252_vm10 = vcmask 64513   ;;  %vm24_vm11 = vcmask 130048   ;;  %vm254_vm12 = vcmask 57344   ;;  %s1128_s30 = smov 16  }
   0xa   :  { %v39_v7 = vld [vmem:[#allocation2] sm:$0xff]  ;;  %v40_v8 = vld [vmem:[#allocation2 + $0x8] sm:$0xff]  ;;  %1010 = vmatprep.subr.mxu1 %v1124_v2  ;;  %25 = vst.msk [vmem:[#allocation4] sm:$0xff] %vm24_vm11, %v1124_v2  ;;  %vm304_vm13 = vcmask 195584   ;;  %vm26_vm14 = vcmask 125952   ;;  %vm399_vm15 = vcmask 123904  }
   0xb   :  { %v41_v9 = vld [vmem:[#allocation2 + $0x10] sm:$0xff]  ;;  %v50_v10 = vrot.slane %v39_v7, 1  ;;  %v51_v11 = vrot.slane %v40_v8, 1  ;;  %v75_v13 = vrot.slane %v39_v7, 2  ;;  %v76_v14 = vrot.slane %v40_v8, 2  ;;  %1011 = vmatpush3.msra.mxu1 %v297_v51  ;;  %s1129_s17 = smov 32  }
   0xc   :  { %v53_v12 = vrot.slane %v41_v9, 1  ;;  %v78_v15 = vrot.slane %v41_v9, 2  ;;  %1012 = vmatprep.subr.mxu1 %v1124_v2  ;;  %27 = vst.msk [vmem:[#allocation4 + $0x8] sm:$0xf] %vm26_vm14, %v1124_v2  ;;  %vm413_vm1 = vcmask 122880   ;;  %vm28_vm2 = vcmask 261120  }
   0xd   :  { %v42_v16 = vld [vmem:[#allocation2 + $0x18] sm:$0xff]  ;;  %v52_v17 = vsel %vm49_vm5, %v50_v10, %v51_v11  ;;  %v77_v19 = vsel %vm74_vm6, %v75_v13, %v76_v14  ;;  %v43_v23 = vld [vmem:[#allocation2 + $0x20] sm:$0xf]  ;;  %29 = vst.msk [vmem:[#allocation5] sm:$0xff] %vm28_vm2, %v1124_v2  ;;  %s1130_s15 = smov 64   ;;  %vm576_vm8 = vcmask 785408  }
   0xe   :  { %v54_v18 = vsel %vm49_vm5, %v51_v11, %v53_v12  ;;  %59 = vrot.lane.b32.xlu0 %v52_v17, %s1126_s20  ;;  %v79_v20 = vsel %vm74_vm6, %v76_v14, %v78_v15  ;;  %v55_v21 = vrot.slane %v42_v16, 1  ;;  %v80_v22 = vrot.slane %v42_v16, 2 }
   0xf   :  { %61 = vrot.lane.b32.xlu1 %v54_v18, %s1126_s20  ;;  %v57_v26 = vrot.slane %v43_v23, 1  ;;  %v82_v27 = vrot.slane %v43_v23, 2 }
  0x10   :  { %v56_v24 = vsel %vm49_vm5, %v53_v12, %v55_v21  ;;  %v81_v25 = vsel %vm74_vm6, %v78_v15, %v80_v22 }
  0x11   :  { %v58_v28 = vsel %vm49_vm5, %v55_v21, %v57_v26  ;;  %v83_v29 = vsel %vm74_vm6, %v80_v22, %v82_v27 }
  0x12   :  { %84 = vrot.lane.b32.xlu0 %v77_v19, %s1127_s21 }
  0x13   :  { %86 = vrot.lane.b32.xlu1 %v79_v20, %s1127_s21 }
  0x16   :  { %63 = vrot.lane.b32.xlu0 %v56_v24, %s1126_s20 }
  0x17   :  { %88 = vrot.lane.b32.xlu1 %v81_v25, %s1127_s21 }
  0x1a   :  { %65 = vrot.lane.b32.xlu0 %v58_v28, %s1126_s20 }
  0x1b   :  { %90 = vrot.lane.b32.xlu1 %v83_v29, %s1127_s21 }
  0x1e   :  { %67 = vrot.lane.b32.xlu0 %v57_v26, %s1126_s20 }
  0x1f   :  { %92 = vrot.lane.b32.xlu1 %v82_v27, %s1127_s21 }
  0x80   :  { %v60_v30 = vpop.permute.xlu0 %59 }
  0x81   :  { %v62_v31 = vpop.permute.xlu1 %61  ;;  %v99_v32 = vsel %vm12_vm0, %v39_v7, %v60_v30 }
  0x82   :  { %v100_v36 = vsel %vm12_vm0, %v40_v8, %v62_v31 }
  0x84   :  { %v85_v33 = vpop.permute.xlu0 %84 }
  0x85   :  { %v87_v34 = vpop.permute.xlu1 %86  ;;  %v104_v35 = vsel %vm19_vm3, %v99_v32, %v85_v33 }
  0x86   :  { %994 = vmatmul.mubr.msk.f32.vlgmr.msra.gmra.mxu0 %vm116_vm7, %v104_v35  ;;  %v105_v39 = vsel %vm19_vm3, %v100_v36, %v87_v34 }
  0x87   :  { %996 = vmatprep.mubr.msk.f32.mxu0 %vm1125_vm4, %v1124_v2 }
  0x88   :  { %v64_v37 = vpop.permute.xlu0 %63 }
  0x89   :  { %v89_v38 = vpop.permute.xlu1 %88  ;;  %v101_v40 = vsel %vm12_vm0, %v41_v9, %v64_v37 }
  0x8a   :  { %997 = vmatmul.mubr.msk.f32.gmra.mxu0 %vm116_vm7, %v105_v39  ;;  %v106_v41 = vsel %vm19_vm3, %v101_v40, %v89_v38 }
  0x8b   :  { %999 = vmatprep.mubr.msk.f32.mxu0 %vm1125_vm4, %v1124_v2 }
  0x8c   :  { %v66_v42 = vpop.permute.xlu0 %65 }
  0x8d   :  { %v91_v43 = vpop.permute.xlu1 %90  ;;  %v102_v44 = vsel %vm12_vm0, %v42_v16, %v66_v42  ;;  %v296_v16 = vld [vmem:[%s1428_s1 + $0x10] sm:$0xff] }
  0x8e   :  { %1000 = vmatmul.mubr.msk.f32.gmra.mxu0 %vm116_vm7, %v106_v41  ;;  %v107_v45 = vsel %vm19_vm3, %v102_v44, %v91_v43  ;;  %1013 = vmatpush3.msra.mxu1 %v296_v16 }
  0x8f   :  { %1002 = vmatprep.mubr.msk.f32.mxu0 %vm1125_vm4, %v1124_v2 }
  0x90   :  { %v68_v46 = vpop.permute.xlu0 %67 }
  0x91   :  { %v93_v47 = vpop.permute.xlu1 %92  ;;  %v103_v48 = vsel %vm12_vm0, %v43_v23, %v68_v46  ;;  %v445_v46 = vld [vmem:[%s1428_s1 + $0x48] sm:$0xff]  ;;  %vm411_vm0 = vcmask 130053  }
  0x92   :  { %1003 = vmatmul.mubr.msk.f32.gmra.mxu0 %vm116_vm7, %v107_v45  ;;  %v108_v49 = vsel %vm19_vm3, %v103_v48, %v93_v47  ;;  %v446_v45 = vld [vmem:[%s1428_s1 + $0x50] sm:$0xff]  ;;  %v444_v47 = vld [vmem:[%s1428_s1 + $0x40] sm:$0xff]  ;;  %v927_v48 = vld [vmem:[%s1428_s1 + $0x109] ss:$0 sm:$0xff] }
  0x93   :  { %1005 = vmatprep.mubr.msk.f32.mxu0 %vm1125_vm4, %v1124_v2  ;;  %1023 = vmatprep.subr.mxu1 %v446_v45 }
  0x96   :  { %1006 = vmatmul.mubr.msk.f32.gmra.mxu0 %vm116_vm7, %v108_v49  ;;  %vm557_vm7 = vcmask 523264  }
  0x97   :  { %1062 = vmatprep.mubr.msk.f32.mxu0 %vm1125_vm4, %v1124_v2 }
 0x146   :  { %v202_v53 = vpop.f32.mrf.mxu0 }
 0x147   :  { %v203_v54 = vadd.f32 %v920_v52, %v202_v53 }
 0x148   :  { %v995_v55 = vpop.f32.mrf.mxu0 }
 0x149   :  { %v226_v56 = vmax.f32 %v203_v54, 0.0 }
 0x14a   :  { %v207_v57 = vpop.f32.mrf.mxu0 }
 0x14b   :  { %231 = vst.msk [vmem:[#allocation6] sm:$0xff] %vm19_vm3, %v226_v56  ;;  %v208_v58 = vadd.f32 %v920_v52, %v207_v57 }
 0x14c   :  { %v998_v59 = vpop.f32.mrf.mxu0 }
 0x14d   :  { %v227_v60 = vmax.f32 %v208_v58, 0.0 }
 0x14e   :  { %v212_v61 = vpop.f32.mrf.mxu0 }
 0x14f   :  { %232 = vst.msk [vmem:[#allocation6 + $0x8] sm:$0xff] %vm19_vm3, %v227_v60  ;;  %v213_v62 = vadd.f32 %v920_v52, %v212_v61 }
 0x150   :  { %v1001_v63 = vpop.f32.mrf.mxu0 }
 0x151   :  { %v228_v0 = vmax.f32 %v213_v62, 0.0 }
 0x152   :  { %v217_v1 = vpop.f32.mrf.mxu0 }
 0x153   :  { %233 = vst.msk [vmem:[#allocation6 + $0x10] sm:$0xff] %vm19_vm3, %v228_v0  ;;  %v218_v3 = vadd.f32 %v920_v52, %v217_v1 }
 0x154   :  { %v1004_v4 = vpop.f32.mrf.mxu0 }
 0x155   :  { %v229_v5 = vmax.f32 %v218_v3, 0.0  ;;  %v443_v4 = vld [vmem:[%s1428_s1 + $0x38] sm:$0xff] }
 0x156   :  { %v237_v6 = vld [vmem:[#allocation6] ss:$2 sm:$0xff]  ;;  %v243_v7 = vld [vmem:[#allocation6 + $0x1] ss:$2 sm:$0xff]  ;;  %v222_v8 = vpop.f32.mrf.mxu0 }
 0x157   :  { %v248_v9 = vmax.f32 %v237_v6, %v243_v7  ;;  %234 = vst.msk [vmem:[#allocation6 + $0x18] sm:$0xff] %vm19_vm3, %v229_v5  ;;  %v223_v10 = vadd.f32 %v920_v52, %v222_v8  ;;  %v442_v5 = vld [vmem:[%s1428_s1 + $0x30] sm:$0xff]  ;;  %v441_v6 = vld [vmem:[%s1428_s1 + $0x28] sm:$0xff] }
 0x158   :  { %v1007_v11 = vpop.f32.mrf.mxu0 }
 0x159   :  { %251 = vst.msk [vmem:[#allocation3 + $0x1] sm:$0xff] %vm19_vm3, %v248_v9  ;;  %v230_v12 = vmax.f32 %v223_v10, 0.0 }
 0x15b   :  { %236 = vst.msk [vmem:[#allocation6 + $0x20] sm:$0x3] %vm235_vm9, %v230_v12 }
 0x15e   :  { %v239_v13 = vld [vmem:[#allocation6 + $0x10] ss:$2 sm:$0xff]  ;;  %v245_v14 = vld [vmem:[#allocation6 + $0x11] ss:$2 sm:$0xff] }
 0x15f   :  { %v249_v15 = vmax.f32 %v239_v13, %v245_v14 }
 0x160   :  { %v256_v20 = vld [vmem:[#allocation3] sm:$0xff] }
 0x161   :  { %253 = vst.msk [vmem:[#allocation3 + $0xa] sm:$0xfe] %vm252_vm10, %v249_v15  ;;  %v276_v22 = vrot.slane %v256_v20, 2  ;;  %v262_v24 = vrot.slane %v256_v20, 1  ;;  %vm651_vm10 = vcmask 259072  }
 0x162   :  { %v241_v17 = vld [vmem:[#allocation6 + $0x20] ss:$2 sm:$0x1]  ;;  %v247_v18 = vld [vmem:[#allocation6 + $0x21] ss:$2 sm:$0x1] }
 0x163   :  { %v250_v19 = vmax.f32 %v241_v17, %v247_v18 }
 0x165   :  { %255 = vst.msk [vmem:[#allocation3 + $0x12] sm:$0x1] %vm254_vm12, %v250_v19 }
 0x168   :  { %v257_v21 = vld [vmem:[#allocation3 + $0x8] sm:$0xff] }
 0x169   :  { %v277_v23 = vrot.slane %v257_v21, 2  ;;  %v263_v25 = vrot.slane %v257_v21, 1 }
 0x16b   :  { %v278_v26 = vsel %vm74_vm6, %v276_v22, %v277_v23  ;;  %v264_v27 = vsel %vm49_vm5, %v262_v24, %v263_v25  ;;  %v569_v24 = vld [vmem:[%s1428_s1 + $0xa8] sm:$0xff] }
 0x16c   :  { %281 = vrot.lane.b32.xlu1 %v278_v26, %s1128_s30  ;;  %267 = vrot.lane.b32.xlu0 %v264_v27, %s1127_s21  ;;  %v258_v28 = vld [vmem:[#allocation3 + $0x10] sm:$0xf]  ;;  %v566_v27 = vld [vmem:[%s1428_s1 + $0x90] sm:$0xff] }
 0x16d   :  { %v279_v29 = vrot.slane %v258_v28, 2  ;;  %v265_v30 = vrot.slane %v258_v28, 1  ;;  %v567_v26 = vld [vmem:[%s1428_s1 + $0x98] sm:$0xff] }
 0x16f   :  { %v280_v31 = vsel %vm74_vm6, %v277_v23, %v279_v29  ;;  %v266_v32 = vsel %vm49_vm5, %v263_v25, %v265_v30  ;;  %v570_v23 = vld [vmem:[%s1428_s1 + $0xb0] sm:$0xff]  ;;  %v568_v25 = vld [vmem:[%s1428_s1 + $0xa0] sm:$0xff] }
 0x170   :  { %283 = vrot.lane.b32.xlu1 %v280_v31, %s1128_s30  ;;  %269 = vrot.lane.b32.xlu0 %v266_v32, %s1127_s21  ;;  %v562_v31 = vld [vmem:[%s1428_s1 + $0x70] sm:$0xff]  ;;  %v561_v32 = vld [vmem:[%s1428_s1 + $0x68] sm:$0xff] }
 0x171   :  { %1039 = vmatpush3.msra.mxu0 %v570_v23 }
 0x172   :  { %1040 = vmatprep.subr.mxu0 %v1124_v2 }
 0x173   :  { %1041 = vmatpush3.msra.mxu0 %v569_v24 }
 0x174   :  { %285 = vrot.lane.b32.xlu1 %v279_v29, %s1128_s30  ;;  %271 = vrot.lane.b32.xlu0 %v265_v30, %s1127_s21  ;;  %v564_v29 = vld [vmem:[%s1428_s1 + $0x80] sm:$0xff]  ;;  %v563_v30 = vld [vmem:[%s1428_s1 + $0x78] sm:$0xff] }
 0x175   :  { %1042 = vmatprep.subr.mxu0 %v1124_v2 }
 0x176   :  { %1043 = vmatpush3.msra.mxu0 %v568_v25 }
 0x177   :  { %1044 = vmatprep.subr.mxu0 %v1124_v2 }
 0x178   :  { %1045 = vmatpush3.msra.mxu0 %v567_v26 }
 0x179   :  { %1046 = vmatprep.subr.mxu0 %v1124_v2 }
 0x17a   :  { %1047 = vmatpush3.msra.mxu0 %v566_v27 }
 0x17b   :  { %1048 = vmatprep.subr.mxu0 %v1124_v2 }
 0x1de   :  { %v282_v33 = vpop.permute.xlu1 %281  ;;  %v268_v34 = vpop.permute.xlu0 %267 }
 0x1df   :  { %v290_v35 = vsel %vm19_vm3, %v256_v20, %v268_v34  ;;  %v931_v34 = vld [vmem:[%s1428_s1 + $0x10a] ss:$0 sm:$0xff] }
 0x1e0   :  { %v293_v36 = vsel %vm24_vm11, %v290_v35, %v282_v33  ;;  %v560_v33 = vld [vmem:[%s1428_s1 + $0x60] sm:$0xff] }
 0x1e1   :  { %1015 = vmatmul.mubr.msk.f32.vlgmr.msra.gmra.mxu1 %vm304_vm13, %v293_v36 }
 0x1e2   :  { %v284_v37 = vpop.permute.xlu1 %283  ;;  %v270_v38 = vpop.permute.xlu0 %269  ;;  %1017 = vmatprep.mubr.msk.f32.mxu1 %vm1125_vm4, %v1124_v2  ;;  %1024 = vmatpush3.msra.mxu1 %v446_v45 }
 0x1e3   :  { %v291_v39 = vsel %vm19_vm3, %v257_v21, %v270_v38  ;;  %1025 = vmatprep.subr.mxu1 %v445_v46 }
 0x1e4   :  { %v294_v40 = vsel %vm24_vm11, %v291_v39, %v284_v37  ;;  %1026 = vmatpush3.msra.mxu1 %v445_v46 }
 0x1e5   :  { %1018 = vmatmul.mubr.msk.f32.gmra.mxu1 %vm304_vm13, %v294_v40  ;;  %1027 = vmatprep.subr.mxu1 %v444_v47 }
 0x1e6   :  { %v286_v41 = vpop.permute.xlu1 %285  ;;  %v272_v42 = vpop.permute.xlu0 %271  ;;  %1020 = vmatprep.mubr.msk.f32.mxu1 %vm1125_vm4, %v1124_v2  ;;  %1028 = vmatpush3.msra.mxu1 %v444_v47 }
 0x1e7   :  { %v292_v43 = vsel %vm19_vm3, %v258_v28, %v272_v42  ;;  %1029 = vmatprep.subr.mxu1 %v443_v4  ;;  %vm452_vm3 = vcmask 392192   ;;  %v565_v28 = vld [vmem:[%s1428_s1 + $0x88] sm:$0xff] }
 0x1e8   :  { %v295_v44 = vsel %vm24_vm11, %v292_v43, %v286_v41  ;;  %1030 = vmatpush3.msra.mxu1 %v443_v4  ;;  %1049 = vmatpush3.msra.mxu0 %v565_v28  ;;  %v740_v4 = vld [vmem:[%s1428_s1 + $0xd8] sm:$0xff] }
 0x1e9   :  { %1021 = vmatmul.mubr.msk.f32.gmra.mxu1 %vm304_vm13, %v295_v44  ;;  %1031 = vmatprep.subr.mxu1 %v442_v5  ;;  %v559_v44 = vld [vmem:[%s1428_s1 + $0x58] sm:$0xff] }
 0x1ea   :  { %1032 = vmatpush3.msra.mxu1 %v442_v5  ;;  %1050 = vmatprep.subr.mxu0 %v1124_v2  ;;  %v936_v5 = vld [vmem:[%s1428_s1 + $0x10c] ss:$0 sm:$0xff] }
 0x1eb   :  { %1033 = vmatprep.subr.mxu1 %v441_v6  ;;  %1051 = vmatpush3.msra.mxu0 %v564_v29 }
 0x1ec   :  { %1034 = vmatpush3.msra.mxu1 %v441_v6  ;;  %1052 = vmatprep.subr.mxu0 %v1124_v2 }
 0x1ed   :  { %1065 = vmatprep.subr.mxu1 %v1124_v2  ;;  %1053 = vmatpush3.msra.mxu0 %v563_v30 }
 0x1ee   :  { %1054 = vmatprep.subr.mxu0 %v1124_v2 }
 0x1ef   :  { %1055 = vmatpush3.msra.mxu0 %v562_v31 }
 0x1f0   :  { %1056 = vmatprep.subr.mxu0 %v1124_v2 }
 0x1f1   :  { %1057 = vmatpush3.msra.mxu0 %v561_v32 }
 0x1f2   :  { %1058 = vmatprep.subr.mxu0 %v1124_v2 }
 0x1f3   :  { %1059 = vmatpush3.msra.mxu0 %v560_v33 }
 0x1f4   :  { %1060 = vmatprep.subr.mxu0 %v1124_v2 }
 0x1f5   :  { %1061 = vmatpush3.msra.mxu0 %v559_v44 }
 0x1f6   :  { %1087 = vmatprep.subr.mxu0 %v1124_v2 }
 0x2a1   :  { %v380_v49 = vpop.f32.mrf.mxu1 }
 0x2a2   :  { %v381_v50 = vadd.f32 %v927_v48, %v380_v49 }
 0x2a3   :  { %v1016_v51 = vpop.f32.mrf.mxu1 }
 0x2a4   :  { %v394_v52 = vmax.f32 %v381_v50, 0.0 }
 0x2a5   :  { %v385_v53 = vpop.f32.mrf.mxu1 }
 0x2a6   :  { %397 = vst.msk [vmem:[#allocation7] sm:$0xff] %vm24_vm11, %v394_v52  ;;  %v386_v54 = vadd.f32 %v927_v48, %v385_v53  ;;  %v660_v52 = vld [vmem:[%s1428_s1 + $0xd0] sm:$0xff]  ;;  %v659_v53 = vld [vmem:[%s1428_s1 + $0xc8] sm:$0xff] }
 0x2a7   :  { %v1019_v55 = vpop.f32.mrf.mxu1 }
 0x2a8   :  { %v395_v56 = vmax.f32 %v386_v54, 0.0  ;;  %v658_v54 = vld [vmem:[%s1428_s1 + $0xc0] sm:$0xff]  ;;  %v657_v55 = vld [vmem:[%s1428_s1 + $0xb8] sm:$0xff] }
 0x2a9   :  { %v390_v57 = vpop.f32.mrf.mxu1 }
 0x2aa   :  { %398 = vst.msk [vmem:[#allocation7 + $0x8] sm:$0xff] %vm24_vm11, %v395_v56  ;;  %v391_v58 = vadd.f32 %v927_v48, %v390_v57  ;;  %v934_v56 = vld [vmem:[%s1428_s1 + $0x10b] ss:$0 sm:$0xff] }
 0x2ab   :  { %v1022_v59 = vpop.f32.mrf.mxu1 }
 0x2ac   :  { %v396_v60 = vmax.f32 %v391_v58, 0.0 }
 0x2ae   :  { %400 = vst.msk [vmem:[#allocation7 + $0x10] sm:$0x3] %vm399_vm15, %v396_v60 }
 0x2b1   :  { %v401_v61 = vld [vmem:[#allocation7] ss:$2 sm:$0xff]  ;;  %v405_v62 = vld [vmem:[#allocation7 + $0x1] ss:$2 sm:$0xff] }
 0x2b2   :  { %v408_v63 = vmax.f32 %v401_v61, %v405_v62 }
 0x2b4   :  { %412 = vst.msk [vmem:[#allocation4 + $0x2] sm:$0xe0] %vm411_vm0, %v408_v63 }
 0x2b5   :  { %410 = vst.msk [vmem:[#allocation4 + $0x1] sm:$0xf] %vm26_vm14, %v408_v63  ;;  %v403_v0 = vld [vmem:[#allocation7 + $0x10] ss:$2 sm:$0x1] }
 0x2b6   :  { %v407_v1 = vld [vmem:[#allocation7 + $0x11] ss:$2 sm:$0x1] }
 0x2b7   :  { %v409_v3 = vmax.f32 %v403_v0, %v407_v1  ;;  %v743_v0 = vld [vmem:[%s1428_s1 + $0xf0] sm:$0xff]  ;;  %v742_v1 = vld [vmem:[%s1428_s1 + $0xe8] sm:$0xff] }
 0x2b9   :  { %414 = vst.msk [vmem:[#allocation4 + $0xa] sm:$0x1] %vm413_vm1, %v409_v3  ;;  %v741_v3 = vld [vmem:[%s1428_s1 + $0xe0] sm:$0xff] }
 0x2bc   :  { %v415_v7 = vld [vmem:[#allocation4] sm:$0xff] }
 0x2bd   :  { %v419_v10 = vrot.slane %v415_v7, 1  ;;  %v428_v13 = vrot.slane %v415_v7, 2 }
 0x2c0   :  { %v416_v8 = vld [vmem:[#allocation4 + $0x8] sm:$0xf] }
 0x2c1   :  { %v420_v9 = vrot.slane %v416_v8, 1  ;;  %v429_v12 = vrot.slane %v416_v8, 2 }
 0x2c3   :  { %424 = vrot.lane.b32.xlu1 %v420_v9, %s1128_s30  ;;  %v421_v11 = vsel %vm49_vm5, %v419_v10, %v420_v9  ;;  %v430_v14 = vsel %vm74_vm6, %v428_v13, %v429_v12  ;;  %vm537_vm5 = vcmask 254976   ;;  %vm544_vm6 = vcmask 258051   ;;  %v824_v10 = vld [vmem:[%s1428_s1 + $0x100] sm:$0xff] }
 0x2c4   :  { %422 = vrot.lane.b32.xlu0 %v421_v11, %s1128_s30  ;;  %v823_v11 = vld [vmem:[%s1428_s1 + $0xf8] sm:$0xff] }
 0x2c7   :  { %433 = vrot.lane.b32.xlu1 %v429_v12, %s1129_s17  ;;  %v938_v12 = vld [vmem:[%s1428_s1 + $0x10d] ss:$0 sm:$0xff] }
 0x2c8   :  { %431 = vrot.lane.b32.xlu0 %v430_v14, %s1129_s17 }
 0x335   :  { %v425_v15 = vpop.permute.xlu1 %424 }
 0x336   :  { %v423_v16 = vpop.permute.xlu0 %422  ;;  %v438_v20 = vsel %vm24_vm11, %v416_v8, %v425_v15 }
 0x337   :  { %v437_v18 = vsel %vm24_vm11, %v415_v7, %v423_v16 }
 0x339   :  { %v434_v17 = vpop.permute.xlu1 %433 }
 0x33a   :  { %v432_v19 = vpop.permute.xlu0 %431  ;;  %v440_v22 = vsel %vm28_vm2, %v438_v20, %v434_v17  ;;  %v940_v17 = vld [vmem:[%s1428_s1 + $0x10e] ss:$0 sm:$0xff] }
 0x33b   :  { %v439_v21 = vsel %vm28_vm2, %v437_v18, %v432_v19 }
 0x33c   :  { %1035 = vmatprep.mubr.msk.f32.mxu1 %vm452_vm3, %v439_v21 }
 0x33d   :  { %1036 = vmatmul.mubr.msk.f32.vlgmr.msra.gmra.mxu1 %vm452_vm3, %v440_v22 }
 0x33e   :  { %1073 = vmatprep.mubr.msk.f32.mxu1 %vm1125_vm4, %v1124_v2  ;;  %1066 = vmatpush3.msra.mxu1 %v660_v52 }
 0x33f   :  { %1067 = vmatprep.subr.mxu1 %v1124_v2 }
 0x340   :  { %1068 = vmatpush3.msra.mxu1 %v659_v53 }
 0x341   :  { %1069 = vmatprep.subr.mxu1 %v1124_v2 }
 0x342   :  { %1070 = vmatpush3.msra.mxu1 %v658_v54 }
 0x343   :  { %1071 = vmatprep.subr.mxu1 %v1124_v2 }
 0x344   :  { %1072 = vmatpush3.msra.mxu1 %v657_v55 }
 0x345   :  { %1076 = vmatprep.subr.mxu1 %v1124_v2 }
 0x3fd   :  { %v1037_v35 = vpop.f32.mrf.mxu1 }
 0x3fe   :  { %v531_v36 = vadd.f32 %v1037_v35, %v931_v34 }
 0x3ff   :  { %v525_v37 = vpop.f32.mrf.mxu1 }
 0x400   :  { %v535_v38 = vmax.f32 %v531_v36, 0.0  ;;  %v526_v39 = vadd.f32 %v931_v34, %v525_v37 }
 0x402   :  { %538 = vst.msk [vmem:[#allocation8 + $0x8] sm:$0x3] %vm537_vm5, %v535_v38  ;;  %v534_v40 = vmax.f32 %v526_v39, 0.0 }
 0x404   :  { %536 = vst.msk [vmem:[#allocation8] sm:$0xff] %vm28_vm2, %v534_v40 }
 0x40b   :  { %v539_v41 = vld [vmem:[#allocation8] ss:$2 sm:$0x1f]  ;;  %v541_v42 = vld [vmem:[#allocation8 + $0x1] ss:$2 sm:$0x1f] }
 0x40c   :  { %v542_v43 = vmax.f32 %v539_v41, %v541_v42 }
 0x40e   :  { %543 = vst.msk [vmem:[#allocation5 + $0x1] sm:$0x3] %vm537_vm5, %v542_v43 }
 0x40f   :  { %545 = vst.msk [vmem:[#allocation5 + $0x2] sm:$0x18] %vm544_vm6, %v542_v43 }
 0x416   :  { %v546_v45 = vld [vmem:[#allocation5] sm:$0xff] }
 0x417   :  { %v552_v46 = vrot.slane %v546_v45, 2  ;;  %v548_v47 = vrot.slane %v546_v45, 1 }
 0x419   :  { %553 = vrot.lane.b32.xlu1 %v552_v46, %s1130_s15  ;;  %549 = vrot.lane.b32.xlu0 %v548_v47, %s1129_s17  ;;  %s1131_s15 = smov [#allocation10]  }
 0x41a   :  { %s910_s16 = sshll.u32 %s1131_s15, 4  ;;  %s911_s16 = int_to_ptr.vmem [resolvable:$true] %s910_s16 }
 0x41b   :  { %s1102_s18 = scalar_lea.vmem %s911_s16, 32  ;;  %p1107_p1 = scmp.lt.s32.totalorder %s911_s16, %s911_s16 }
 0x41c   :  { %p1103_p0 = scmp.ne.s32.totalorder %s911_s16, %s1102_s18  ;;  %p1108_p2 = scmp.lt.s32.totalorder %s1102_s18, %s1102_s18 }
 0x41e   :  { %p1109_p3 = por %p1108_p2, %p1107_p1 }
 0x420   :  { %p1110_p4 = pnand %p1109_p3, %p1103_p0 }
 0x48b   :  { %v554_v48 = vpop.permute.xlu1 %553  ;;  %v550_v49 = vpop.permute.xlu0 %549 }
 0x48c   :  { %v556_v50 = vsel %vm28_vm2, %v546_v45, %v550_v49 }
 0x48d   :  { %v558_v51 = vsel %vm557_vm7, %v556_v50, %v554_v48 }
 0x48e   :  { %1063 = vmatmul.mubr.msk.f32.vlgmr.msra.gmra.mxu0 %vm576_vm8, %v558_v51 }
 0x48f   :  { %1091 = vmatprep.mubr.msk.f32.mxu0 %vm1125_vm4, %v1124_v2  ;;  %1088 = vmatpush3.msra.mxu0 %v824_v10 }
 0x490   :  { %1089 = vmatprep.subr.mxu0 %v1124_v2 }
 0x491   :  { %1090 = vmatpush3.msra.mxu0 %v823_v11 }
 0x54e   :  { %v646_v57 = vpop.f32.mrf.mxu0 }
 0x54f   :  { %v647_v58 = vadd.f32 %v934_v56, %v646_v57 }
 0x550   :  { %v1064_v59 = vpop.f32.mrf.mxu0 }
 0x551   :  { %v650_v60 = vmax.f32 %v647_v58, 0.0 }
 0x553   :  { %652 = vst.msk [vmem:[#allocation9] sm:$0x3f] %vm651_vm10, %v650_v60 }
 0x55a   :  { %v653_v61 = vld [vmem:[#allocation9] ss:$4 sm:$0x3]  ;;  %v655_v62 = vld [vmem:[#allocation9 + $0x1] ss:$4 sm:$0x3] }
 0x55b   :  { %v656_v63 = vmax.f32 %v653_v61, %v655_v62 }
 0x55d   :  { %1074 = vmatmul.mubr.msk.f32.vlgmr.msra.gmra.mxu1 %vm28_vm2, %v656_v63 }
 0x55e   :  { %1077 = vmatpush3.msra.mxu1 %v743_v0  ;;  %1084 = vmatprep.mubr.msk.f32.mxu1 %vm1125_vm4, %v1124_v2 }
 0x55f   :  { %1078 = vmatprep.subr.mxu1 %v1124_v2 }
 0x560   :  { %1079 = vmatpush3.msra.mxu1 %v742_v1 }
 0x561   :  { %1080 = vmatprep.subr.mxu1 %v1124_v2 }
 0x562   :  { %1081 = vmatpush3.msra.mxu1 %v741_v3 }
 0x563   :  { %1082 = vmatprep.subr.mxu1 %v1124_v2 }
 0x564   :  { %1083 = vmatpush3.msra.mxu1 %v740_v4 }
 0x61d   :  { %v735_v6 = vpop.f32.mrf.mxu1 }
 0x61e   :  { %v736_v7 = vadd.f32 %v936_v5, %v735_v6 }
 0x61f   :  { %v1075_v8 = vpop.f32.mrf.mxu1 }
 0x620   :  { %v739_v9 = vmax.f32 %v736_v7, 0.0 }
 0x622   :  { %1085 = vmatmul.mubr.msk.f32.vlgmr.msra.gmra.mxu1 %vm28_vm2, %v739_v9 }
 0x6e2   :  { %v818_v13 = vpop.f32.mrf.mxu1 }
 0x6e3   :  { %v819_v14 = vadd.f32 %v938_v12, %v818_v13 }
 0x6e4   :  { %v1086_v15 = vpop.f32.mrf.mxu1 }
 0x6e5   :  { %v822_v16 = vmax.f32 %v819_v14, 0.0 }
 0x6e7   :  { %1092 = vmatmul.mubr.msk.f32.vlgmr.msra.gmra.mxu0 %vm24_vm11, %v822_v16 }
 0x7a7   :  { %v899_v2 = vpop.f32.mrf.mxu0 }
 0x7a8   :  { %v900_v18 = vadd.f32 %v940_v17, %v899_v2 }
 0x7a9   :  { %v1093_v19 = vpop.f32.mrf.mxu0 }
 0x7aa   :  { %903 = vst.msk [vmem:[#allocation10] sm:$0x3] %vm235_vm9, %v900_v18 }
 0x7ab   :  { %1113 = shalt.err (!%p1110_p4)
}
 0x7ac   :  { %913 = dma.vmem_to_hbm [thread:$0]  %s911_s16, 32, %s1429_s2, [#allocation11]  }
 0x7ad   :  { %1122 = dma.done.wait [#allocation11], 32  }
 0x7ae   :  { %1123 = vsyncadd [#allocation11], 4294967264 }
 0x7af   :  { %917 = vsyncpa [#allocation11], 1 }

</bundles_post_ra>
